<compile_context>
chip_gen: v5e
topology: v5e:2x2
jax: 0.10.0
libtpu: 0.0.40
codegen_flags: <defaults>
</compile_context>

<pallas_src>
import math

import jax
import jax.numpy as jnp
from jax.experimental import pallas as pl
from jax.experimental.pallas import tpu as pltpu  # noqa: F401  (TPU backend assumed)


# ----------------------------------------------------------------------------- helpers
def _round_up(v, m):
    return ((v + m - 1) // m) * m


def _pad_to(a, shape):
    return jnp.pad(a, [(0, t - s) for s, t in zip(a.shape, shape)])


def _fold_bn(p, eps=1e-5):
    """Fold eval-mode BatchNorm1d + bias into the GCN weights.

    BN(adj@(xW) + xWs + b) == adj@(x (W*scale)) + x (Ws*scale) + ((b - rmean)*scale + beta)
    with scale = gamma / sqrt(rvar + eps) (per output feature, i.e. per weight column).
    """
    scale = p["gamma"] * jax.lax.rsqrt(p["rvar"] + eps)       # [F]
    w = p["w"] * scale[None, :]
    ws = p["w_self"] * scale[None, :]
    b = (p["bias"] - p["rmean"]) * scale + p["beta"]
    return w, ws, b


# ----------------------------------------------------------------------------- kernel
def _make_tpgcn_kernel(n_transform, n_propagate, f_pad):
    """Fused TPGCNBlock forward (all layers) in a single kernel body."""

    def kernel(x_ref, adj_ref, wt_ref, bt_ref, wp_ref, bp_ref, o_ref):
        h = x_ref[...]                                         # f32 [Np, Fp]

        # ---- transform phase: adjacency == I  =>  h = relu(h @ (W+Ws)' + b') ----
        for i in range(n_transform):
            out = jnp.dot(h.astype(jnp.bfloat16), wt_ref[i],
                          preferred_element_type=jnp.float32)
            h = jnp.maximum(out + bt_ref[i], 0.0)

        # ---- propagate phase: h = relu(adj @ (h @ W') + h @ Ws' + b') ----
        adj = adj_ref[...]                                     # bf16 [Np, Np]
        for i in range(n_propagate):
            both = jnp.dot(h.astype(jnp.bfloat16), wp_ref[i],
                           preferred_element_type=jnp.float32)  # [Np, 2*Fp] = [xW' | xWs']
            support = both[:, :f_pad].astype(jnp.bfloat16)
            self_term = both[:, f_pad:]
            out = jnp.dot(adj, support, preferred_element_type=jnp.float32)
            h = jnp.maximum(out + self_term + bp_ref[i], 0.0)

        o_ref[...] = h

    return kernel


# ----------------------------------------------------------------------------- wrapper
def tpgcn_block_forward(x, adj, transform_params, propagate_params):
    """Eval-mode TPGCNBlock.forward(x, adj) via one fused pallas_call."""
    N, F = x.shape
    Np = _round_up(N, 8)          # sublane multiple
    Fp = _round_up(F, 128)        # lane-dense feature axis
    Lt = len(transform_params)
    Lp = len(propagate_params)

    # Fold BN/bias, merge W & W_self, zero-pad to lane-dense shapes, stack per phase.
    wt_l, bt_l, wp_l, bp_l = [], [], [], []
    for p in transform_params:
        w, ws, b = _fold_bn(p)
        wt_l.append(_pad_to(w + ws, (Fp, Fp)))                 # identity adj: fold W + W_self
        bt_l.append(_pad_to(b[None, :], (1, Fp)))
    for p in propagate_params:
        w, ws, b = _fold_bn(p)
        wp_l.append(jnp.concatenate(
            [_pad_to(w, (Fp, Fp)), _pad_to(ws, (Fp, Fp))], axis=1))   # [Fp, 2Fp]
        bp_l.append(_pad_to(b[None, :], (1, Fp)))

    wt = jnp.stack(wt_l).astype(jnp.bfloat16)                  # [Lt, Fp, Fp]
    bt = jnp.stack(bt_l).astype(jnp.float32)                   # [Lt, 1, Fp]
    wp = jnp.stack(wp_l).astype(jnp.bfloat16)                  # [Lp, Fp, 2Fp]
    bp = jnp.stack(bp_l).astype(jnp.float32)                   # [Lp, 1, Fp]

    xp = _pad_to(x.astype(jnp.float32), (Np, Fp))              # [Np, Fp] f32
    adjp = _pad_to(adj, (Np, Np)).astype(jnp.bfloat16)         # [Np, Np] bf16

    kernel = _make_tpgcn_kernel(Lt, Lp, Fp)
    full = lambda shape: pl.BlockSpec(shape, lambda: (0,) * len(shape))

    out = pl.pallas_call(
        kernel,
        out_shape=jax.ShapeDtypeStruct((Np, Fp), jnp.float32),
        in_specs=[
            full((Np, Fp)),           # x
            full((Np, Np)),           # adj
            full((Lt, Fp, Fp)),       # transform weights (BN-folded, W+W_self merged)
            full((Lt, 1, Fp)),        # transform biases
            full((Lp, Fp, 2 * Fp)),   # propagate weights [W' | Ws']
            full((Lp, 1, Fp)),        # propagate biases
        ],
        out_specs=full((Np, Fp)),
    )(xp, adjp, wt, bt, wp, bp)

    return out[:N, :F]


# ----------------------------------------------------------------------------- reference
def _reference_forward(x, adj, transform_params, propagate_params, eps=1e-5):
    """Pure-JAX f32 reference matching the PyTorch forward (eval mode)."""
    def layer(h, a, p):
        out = a @ (h @ p["w"]) + h @ p["w_self"] + p["bias"]
        out = (out - p["rmean"]) * jax.lax.rsqrt(p["rvar"] + eps) * p["gamma"] + p["beta"]
        return jnp.maximum(out, 0.0)

    eye = jnp.eye(x.shape[0], dtype=x.dtype)
    h = x
    for p in transform_params:
        h = layer(h, eye, p)
    for p in propagate_params:
        h = layer(h, adj, p)
    return h


# ----------------------------------------------------------------------------- params
def make_gcn_layer_params(key, f):
    k1, k2, k3, k4, k5, k6, k7 = jax.random.split(key, 7)
    stdv = math.sqrt(6.0 / (f + f))                            # glorot
    return {
        "w": jax.random.uniform(k1, (f, f), jnp.float32, -stdv, stdv),
        "w_self": jax.random.uniform(k2, (f, f), jnp.float32, -stdv, stdv),
        "bias": 0.1 * jax.random.normal(k3, (f,), jnp.float32),
        "gamma": jax.random.uniform(k4, (f,), jnp.float32, 0.5, 1.5),
        "beta": 0.1 * jax.random.normal(k5, (f,), jnp.float32),
        "rmean": 0.1 * jax.random.normal(k6, (f,), jnp.float32),
        "rvar": jax.random.uniform(k7, (f,), jnp.float32, 0.5, 1.5),
    }


# ----------------------------------------------------------------------------- demo
if __name__ == "__main__":
    N, F_DIM, NBASELAYER = 8, 32, 4        # TPGCNBlock: 2 transform + 2 propagate layers

    key = jax.random.PRNGKey(0)
    kx, kadj, kt, kp = jax.random.split(key, 4)

    x = jax.random.normal(kx, (N, F_DIM), jnp.float32)

    # Deterministic dense adjacency: random 0/1 mask + self loops, row-normalized.
    raw = (jax.random.uniform(kadj, (N, N)) > 0.5).astype(jnp.float32)
    adj = raw + jnp.eye(N, dtype=jnp.float32)
    adj = adj / jnp.sum(adj, axis=1, keepdims=True)

    n_half = NBASELAYER // 2
    transform_params = [make_gcn_layer_params(k, F_DIM) for k in jax.random.split(kt, n_half)]
    propagate_params = [make_gcn_layer_params(k, F_DIM) for k in jax.random.split(kp, n_half)]

    out = jax.jit(tpgcn_block_forward)(x, adj, transform_params, propagate_params)
    out = jax.block_until_ready(out)

    assert out.shape == (N, F_DIM)
    assert bool(jnp.all(jnp.isfinite(out)))

    # Correctness vs. full-precision reference (bf16 MXU operands -> loose tolerance).
    ref = _reference_forward(x, adj, transform_params, propagate_params)
    rel_err = float(jnp.linalg.norm(out - ref) / (jnp.linalg.norm(ref) + 1e-6))
    assert rel_err < 0.05, f"relative error vs f32 reference too large: {rel_err}"

    print("KERNEL_OK")
</pallas_src>

<mosaic_0001>
module attributes {stable_mosaic.version = 11 : i64} {
  func.func @kernel(%arg0: memref<8x128xf32, #tpu.memory_space<vmem>>, %arg1: memref<8x8xbf16, #tpu.memory_space<vmem>>, %arg2: memref<2x128x128xbf16, #tpu.memory_space<vmem>>, %arg3: memref<2x1x128xf32, #tpu.memory_space<vmem>>, %arg4: memref<2x128x256xbf16, #tpu.memory_space<vmem>>, %arg5: memref<2x1x128xf32, #tpu.memory_space<vmem>>, %arg6: memref<8x128xf32, #tpu.memory_space<vmem>>) attributes {dimension_semantics = [], scalar_prefetch = 0 : i64, scratch_operands = 0 : i64, tpu.core_type = #tpu.core_type<tc>} {
    %c0 = arith.constant 0 : index
    %c0_0 = arith.constant 0 : index
    %0 = vector.load %arg0[%c0, %c0_0] : memref<8x128xf32, #tpu.memory_space<vmem>>, vector<8x128xf32>
    %1 = arith.truncf %0 : vector<8x128xf32> to vector<8x128xbf16>
    %c0_1 = arith.constant 0 : index
    %c0_2 = arith.constant 0 : index
    %c0_3 = arith.constant 0 : index
    %2 = vector.load %arg2[%c0_1, %c0_2, %c0_3] : memref<2x128x128xbf16, #tpu.memory_space<vmem>>, vector<1x128x128xbf16>
    %3 = vector.shape_cast %2 : vector<1x128x128xbf16> to vector<128x128xbf16>
    %cst = arith.constant dense<0.000000e+00> : vector<8x128xf32>
    %4 = tpu.matmul %1, %3, %cst {dimension_numbers = #tpu.dot_dimension_numbers<[1], [0], [0], [1], [0, 0, 1, 1], [], []>} : vector<8x128xbf16>, vector<128x128xbf16>, vector<8x128xf32> -> vector<8x128xf32>
    %c0_4 = arith.constant 0 : index
    %c0_5 = arith.constant 0 : index
    %c0_6 = arith.constant 0 : index
    %5 = vector.load %arg3[%c0_4, %c0_5, %c0_6] : memref<2x1x128xf32, #tpu.memory_space<vmem>>, vector<1x1x128xf32>
    %6 = vector.shape_cast %5 : vector<1x1x128xf32> to vector<1x128xf32>
    %7 = vector.broadcast %6 : vector<1x128xf32> to vector<8x128xf32>
    %8 = arith.addf %4, %7 : vector<8x128xf32>
    %cst_7 = arith.constant 0.000000e+00 : f32
    %9 = vector.broadcast %cst_7 : f32 to vector<8x128xf32>
    %10 = arith.maximumf %8, %9 : vector<8x128xf32>
    %11 = arith.truncf %10 : vector<8x128xf32> to vector<8x128xbf16>
    %c1 = arith.constant 1 : index
    %c0_8 = arith.constant 0 : index
    %c0_9 = arith.constant 0 : index
    %12 = vector.load %arg2[%c1, %c0_8, %c0_9] : memref<2x128x128xbf16, #tpu.memory_space<vmem>>, vector<1x128x128xbf16>
    %13 = vector.shape_cast %12 : vector<1x128x128xbf16> to vector<128x128xbf16>
    %cst_10 = arith.constant dense<0.000000e+00> : vector<8x128xf32>
    %14 = tpu.matmul %11, %13, %cst_10 {dimension_numbers = #tpu.dot_dimension_numbers<[1], [0], [0], [1], [0, 0, 1, 1], [], []>} : vector<8x128xbf16>, vector<128x128xbf16>, vector<8x128xf32> -> vector<8x128xf32>
    %c1_11 = arith.constant 1 : index
    %c0_12 = arith.constant 0 : index
    %c0_13 = arith.constant 0 : index
    %15 = vector.load %arg3[%c1_11, %c0_12, %c0_13] : memref<2x1x128xf32, #tpu.memory_space<vmem>>, vector<1x1x128xf32>
    %16 = vector.shape_cast %15 : vector<1x1x128xf32> to vector<1x128xf32>
    %17 = vector.broadcast %16 : vector<1x128xf32> to vector<8x128xf32>
    %18 = arith.addf %14, %17 : vector<8x128xf32>
    %cst_14 = arith.constant 0.000000e+00 : f32
    %19 = vector.broadcast %cst_14 : f32 to vector<8x128xf32>
    %20 = arith.maximumf %18, %19 : vector<8x128xf32>
    %c0_15 = arith.constant 0 : index
    %c0_16 = arith.constant 0 : index
    %21 = vector.load %arg1[%c0_15, %c0_16] : memref<8x8xbf16, #tpu.memory_space<vmem>>, vector<8x8xbf16>
    %22 = arith.truncf %20 : vector<8x128xf32> to vector<8x128xbf16>
    %c0_17 = arith.constant 0 : index
    %c0_18 = arith.constant 0 : index
    %c0_19 = arith.constant 0 : index
    %23 = vector.load %arg4[%c0_17, %c0_18, %c0_19] : memref<2x128x256xbf16, #tpu.memory_space<vmem>>, vector<1x128x256xbf16>
    %24 = vector.shape_cast %23 : vector<1x128x256xbf16> to vector<128x256xbf16>
    %cst_20 = arith.constant dense<0.000000e+00> : vector<8x256xf32>
    %25 = tpu.matmul %22, %24, %cst_20 {dimension_numbers = #tpu.dot_dimension_numbers<[1], [0], [0], [1], [0, 0, 1, 1], [], []>} : vector<8x128xbf16>, vector<128x256xbf16>, vector<8x256xf32> -> vector<8x256xf32>
    %26 = vector.extract_strided_slice %25 {offsets = [0, 0], sizes = [8, 128], strides = [1, 1]} : vector<8x256xf32> to vector<8x128xf32>
    %27 = arith.truncf %26 : vector<8x128xf32> to vector<8x128xbf16>
    %28 = vector.extract_strided_slice %25 {offsets = [0, 128], sizes = [8, 128], strides = [1, 1]} : vector<8x256xf32> to vector<8x128xf32>
    %cst_21 = arith.constant dense<0.000000e+00> : vector<8x128xf32>
    %29 = tpu.matmul %21, %27, %cst_21 {dimension_numbers = #tpu.dot_dimension_numbers<[1], [0], [0], [1], [0, 0, 1, 1], [], []>} : vector<8x8xbf16>, vector<8x128xbf16>, vector<8x128xf32> -> vector<8x128xf32>
    %30 = arith.addf %29, %28 : vector<8x128xf32>
    %c0_22 = arith.constant 0 : index
    %c0_23 = arith.constant 0 : index
    %c0_24 = arith.constant 0 : index
    %31 = vector.load %arg5[%c0_22, %c0_23, %c0_24] : memref<2x1x128xf32, #tpu.memory_space<vmem>>, vector<1x1x128xf32>
    %32 = vector.shape_cast %31 : vector<1x1x128xf32> to vector<1x128xf32>
    %33 = vector.broadcast %32 : vector<1x128xf32> to vector<8x128xf32>
    %34 = arith.addf %30, %33 : vector<8x128xf32>
    %cst_25 = arith.constant 0.000000e+00 : f32
    %35 = vector.broadcast %cst_25 : f32 to vector<8x128xf32>
    %36 = arith.maximumf %34, %35 : vector<8x128xf32>
    %37 = arith.truncf %36 : vector<8x128xf32> to vector<8x128xbf16>
    %c1_26 = arith.constant 1 : index
    %c0_27 = arith.constant 0 : index
    %c0_28 = arith.constant 0 : index
    %38 = vector.load %arg4[%c1_26, %c0_27, %c0_28] : memref<2x128x256xbf16, #tpu.memory_space<vmem>>, vector<1x128x256xbf16>
    %39 = vector.shape_cast %38 : vector<1x128x256xbf16> to vector<128x256xbf16>
    %cst_29 = arith.constant dense<0.000000e+00> : vector<8x256xf32>
    %40 = tpu.matmul %37, %39, %cst_29 {dimension_numbers = #tpu.dot_dimension_numbers<[1], [0], [0], [1], [0, 0, 1, 1], [], []>} : vector<8x128xbf16>, vector<128x256xbf16>, vector<8x256xf32> -> vector<8x256xf32>
    %41 = vector.extract_strided_slice %40 {offsets = [0, 0], sizes = [8, 128], strides = [1, 1]} : vector<8x256xf32> to vector<8x128xf32>
    %42 = arith.truncf %41 : vector<8x128xf32> to vector<8x128xbf16>
    %43 = vector.extract_strided_slice %40 {offsets = [0, 128], sizes = [8, 128], strides = [1, 1]} : vector<8x256xf32> to vector<8x128xf32>
    %cst_30 = arith.constant dense<0.000000e+00> : vector<8x128xf32>
    %44 = tpu.matmul %21, %42, %cst_30 {dimension_numbers = #tpu.dot_dimension_numbers<[1], [0], [0], [1], [0, 0, 1, 1], [], []>} : vector<8x8xbf16>, vector<8x128xbf16>, vector<8x128xf32> -> vector<8x128xf32>
    %45 = arith.addf %44, %43 : vector<8x128xf32>
    %c1_31 = arith.constant 1 : index
    %c0_32 = arith.constant 0 : index
    %c0_33 = arith.constant 0 : index
    %46 = vector.load %arg5[%c1_31, %c0_32, %c0_33] : memref<2x1x128xf32, #tpu.memory_space<vmem>>, vector<1x1x128xf32>
    %47 = vector.shape_cast %46 : vector<1x1x128xf32> to vector<1x128xf32>
    %48 = vector.broadcast %47 : vector<1x128xf32> to vector<8x128xf32>
    %49 = arith.addf %45, %48 : vector<8x128xf32>
    %cst_34 = arith.constant 0.000000e+00 : f32
    %50 = vector.broadcast %cst_34 : f32 to vector<8x128xf32>
    %51 = arith.maximumf %49, %50 : vector<8x128xf32>
    %c0_35 = arith.constant 0 : index
    %c0_36 = arith.constant 0 : index
    %52 = vector.load %arg6[%c0_35, %c0_36] : memref<8x128xf32, #tpu.memory_space<vmem>>, vector<8x128xf32>
    tpu.vector_store %arg6[%c0_35, %c0_36], %51 {strides = array<i32>} : memref<8x128xf32, #tpu.memory_space<vmem>>, vector<8x128xf32>,
    return
  }
}

</mosaic_0001>

<bundles_post_ra>
// kernel: tpgcn_block_forward.1
= control target key start
LH: loop header
LB: loop body
LE: loop exit
PB: predicated region body
PF: predicated region fallthrough
CT: control target
= control target key end

     0   :  { %s1119_s0 = inlined_call_operand.vmem [shape: f32[8,128], index: 0, kind: input, shape index: {}]   ;;  %s1120_s1 = inlined_call_operand.vmem [shape: bf16[8,8], index: 1, kind: input, shape index: {}]   ;;  %s1121_s2 = inlined_call_operand.vmem [shape: bf16[2,128,128], index: 2, kind: input, shape index: {}]   ;;  %s1122_s3 = inlined_call_operand.vmem [shape: f32[2,1,128], index: 3, kind: input, shape index: {}]   ;;  %s1123_s4 = inlined_call_operand.vmem [shape: bf16[2,128,256], index: 4, kind: input, shape index: {}]   ;;  %s1124_s5 = inlined_call_operand.vmem [shape: f32[2,1,128], index: 5, kind: input, shape index: {}]   ;;  %s1125_s6 = inlined_call_operand.hbm [shape: f32[8,128], index: 6, kind: output, shape index: {}]  }
   0x1   :  { %v746_v0 = vld [vmem:[%s1121_s2 + $0x38] sm:$0xff]  ;;  %v745_v1 = vld [vmem:[%s1121_s2 + $0x30] sm:$0xff]  ;;  %v744_v3 = vld [vmem:[%s1121_s2 + $0x28] sm:$0xff] }
   0x2   :  { %95 = vmatpush.bf16.msra.mxu0 %v746_v0  ;;  %v754_v2 = vld [vmem:[%s1121_s2 + $0x78] sm:$0xff]  ;;  %v753_v4 = vld [vmem:[%s1121_s2 + $0x70] sm:$0xff] }
   0x3   :  { %180 = vmatpush.bf16.msra.mxu1 %v754_v2 }
   0x6   :  { %96 = vmatpush.bf16.msra.mxu0 %v745_v1 }
   0x7   :  { %11 = vsyncpa [#allocation3], 0  ;;  %181 = vmatpush.bf16.msra.mxu1 %v753_v4  ;;  %v752_v5 = vld [vmem:[%s1121_s2 + $0x68] sm:$0xff]  ;;  %v743_v6 = vld [vmem:[%s1121_s2 + $0x20] sm:$0xff]  ;;  %vm323_vm0 = vcmask 1043456   ;;  %vm319_vm1 = vcmask 64512  }
   0x8   :  { %v751_v7 = vld [vmem:[%s1121_s2 + $0x60] sm:$0xff]  ;;  %v742_v8 = vld [vmem:[%s1121_s2 + $0x18] sm:$0xff]  ;;  %v741_v10 = vld [vmem:[%s1121_s2 + $0x10] sm:$0xff]  ;;  %s818_s10 = smov [#allocation2]   ;;  %s502_s13 = sshll.u32 %s1125_s6, 4  ;;  %s503_s13 = int_to_ptr.hbm [resolvable:$true] %s502_s13 }
   0x9   :  { %v750_v9 = vld [vmem:[%s1121_s2 + $0x58] sm:$0xff]  ;;  %v749_v11 = vld [vmem:[%s1121_s2 + $0x50] sm:$0xff]  ;;  %v740_v12 = vld [vmem:[%s1121_s2 + $0x8] sm:$0xff] }
   0xa   :  { %97 = vmatpush.bf16.msra.mxu0 %v744_v3  ;;  %v739_v13 = vld [vmem:[%s1121_s2] sm:$0xff]  ;;  %v748_v16 = vld [vmem:[%s1121_s2 + $0x48] sm:$0xff]  ;;  %v650_v18 = vld [vmem:[%s1123_s4 + $0x70] sm:$0xf] }
   0xb   :  { %182 = vmatpush.bf16.msra.mxu1 %v752_v5  ;;  %v25_v14 = vld [vmem:[%s1119_s0] sm:$0xff]  ;;  %v770_v19 = vld [vmem:[%s1123_s4 + $0x74] sm:$0xf0]  ;;  %v769_v20 = vld [vmem:[%s1123_s4 + $0x74] sm:$0xf]  ;;  %s500_s0 = sshll.u32 %s818_s10, 4  ;;  %s501_s0 = int_to_ptr.vmem [resolvable:$true] %s500_s0 }
   0xc   :  { %v26_v15 = vpack.c.bf16 %v25_v14, %v25_v14  ;;  %v747_v17 = vld [vmem:[%s1121_s2 + $0x40] sm:$0xff]  ;;  %v651_v21 = vor.u32 %v770_v19, %v650_v18  ;;  %v652_v22 = vld [vmem:[%s1123_s4 + $0x78] sm:$0xf0]  ;;  %v768_v24 = vld [vmem:[%s1123_s4 + $0x64] sm:$0xf0] }
   0xd   :  { %v642_v23 = vld [vmem:[%s1123_s4 + $0x60] sm:$0xf]  ;;  %v655_v25 = vor.u32 %v769_v20, %v652_v22  ;;  %v767_v26 = vld [vmem:[%s1123_s4 + $0x64] sm:$0xf]  ;;  %v644_v27 = vld [vmem:[%s1123_s4 + $0x68] sm:$0xf0] }
   0xe   :  { %98 = vmatpush.bf16.msra.mxu0 %v743_v6  ;;  %292 = vmatpush.bf16.msra.mxu2 %v651_v21  ;;  %v643_v28 = vor.u32 %v768_v24, %v642_v23  ;;  %v647_v29 = vor.u32 %v767_v26, %v644_v27  ;;  %v634_v30 = vld [vmem:[%s1123_s4 + $0x50] sm:$0xf]  ;;  %v766_v31 = vld [vmem:[%s1123_s4 + $0x54] sm:$0xf0]  ;;  %v765_v32 = vld [vmem:[%s1123_s4 + $0x54] sm:$0xf] }
   0xf   :  { %183 = vmatpush.bf16.msra.mxu1 %v751_v7  ;;  %305 = vmatpush.bf16.msra.mxu3 %v655_v25  ;;  %v636_v33 = vld [vmem:[%s1123_s4 + $0x58] sm:$0xf0]  ;;  %v635_v34 = vor.u32 %v766_v31, %v634_v30  ;;  %v626_v36 = vld [vmem:[%s1123_s4 + $0x40] sm:$0xf]  ;;  %v764_v37 = vld [vmem:[%s1123_s4 + $0x44] sm:$0xf0] }
  0x10   :  { %v639_v35 = vor.u32 %v765_v32, %v636_v33  ;;  %v763_v38 = vld [vmem:[%s1123_s4 + $0x44] sm:$0xf]  ;;  %v628_v39 = vld [vmem:[%s1123_s4 + $0x48] sm:$0xf0]  ;;  %v627_v40 = vor.u32 %v764_v37, %v626_v36  ;;  %v618_v42 = vld [vmem:[%s1123_s4 + $0x30] sm:$0xf] }
  0x11   :  { %v631_v41 = vor.u32 %v763_v38, %v628_v39  ;;  %v762_v43 = vld [vmem:[%s1123_s4 + $0x34] sm:$0xf0]  ;;  %v761_v44 = vld [vmem:[%s1123_s4 + $0x34] sm:$0xf]  ;;  %v620_v45 = vld [vmem:[%s1123_s4 + $0x38] sm:$0xf0] }
  0x12   :  { %99 = vmatpush.bf16.msra.mxu0 %v742_v8  ;;  %293 = vmatpush.bf16.msra.mxu2 %v643_v28  ;;  %v619_v46 = vor.u32 %v762_v43, %v618_v42  ;;  %v623_v47 = vor.u32 %v761_v44, %v620_v45  ;;  %v610_v48 = vld [vmem:[%s1123_s4 + $0x20] sm:$0xf]  ;;  %v760_v49 = vld [vmem:[%s1123_s4 + $0x24] sm:$0xf0]  ;;  %v759_v50 = vld [vmem:[%s1123_s4 + $0x24] sm:$0xf] }
  0x13   :  { %184 = vmatpush.bf16.msra.mxu1 %v750_v9  ;;  %306 = vmatpush.bf16.msra.mxu3 %v647_v29  ;;  %v612_v51 = vld [vmem:[%s1123_s4 + $0x28] sm:$0xf0]  ;;  %v611_v52 = vor.u32 %v760_v49, %v610_v48  ;;  %v788_v54 = vld [vmem:[%s1122_s3] ss:$0 sm:$0xff]  ;;  %v602_v60 = vld [vmem:[%s1123_s4 + $0x10] sm:$0xf] }
  0x14   :  { %v615_v53 = vor.u32 %v759_v50, %v612_v51  ;;  %v758_v61 = vld [vmem:[%s1123_s4 + $0x14] sm:$0xf0]  ;;  %v757_v62 = vld [vmem:[%s1123_s4 + $0x14] sm:$0xf]  ;;  %v604_v0 = vld [vmem:[%s1123_s4 + $0x18] sm:$0xf0] }
  0x15   :  { %v603_v63 = vor.u32 %v758_v61, %v602_v60  ;;  %v607_v1 = vor.u32 %v757_v62, %v604_v0  ;;  %v594_v2 = vld [vmem:[%s1123_s4] sm:$0xf]  ;;  %v756_v3 = vld [vmem:[%s1123_s4 + $0x4] sm:$0xf0]  ;;  %v755_v4 = vld [vmem:[%s1123_s4 + $0x4] sm:$0xf] }
  0x16   :  { %100 = vmatpush.bf16.msra.mxu0 %v741_v10  ;;  %294 = vmatpush.bf16.msra.mxu2 %v635_v34  ;;  %v595_v5 = vor.u32 %v756_v3, %v594_v2  ;;  %v596_v6 = vld [vmem:[%s1123_s4 + $0x8] sm:$0xf0]  ;;  %v789_v8 = vld [vmem:[%s1122_s3 + $0x1] ss:$0 sm:$0xff]  ;;  %v731_v14 = vld [vmem:[%s1123_s4 + $0xf0] sm:$0xf] }
  0x17   :  { %185 = vmatpush.bf16.msra.mxu1 %v749_v11  ;;  %307 = vmatpush.bf16.msra.mxu3 %v639_v35  ;;  %v599_v7 = vor.u32 %v755_v4, %v596_v6  ;;  %v733_v18 = vld [vmem:[%s1123_s4 + $0xf8] sm:$0xf0]  ;;  %v723_v19 = vld [vmem:[%s1123_s4 + $0xe0] sm:$0xf]  ;;  %v784_v20 = vld [vmem:[%s1123_s4 + $0xe4] sm:$0xf0] }
  0x18   :  { %v783_v22 = vld [vmem:[%s1123_s4 + $0xe4] sm:$0xf]  ;;  %v725_v23 = vld [vmem:[%s1123_s4 + $0xe8] sm:$0xf0]  ;;  %v724_v24 = vor.u32 %v784_v20, %v723_v19  ;;  %v715_v26 = vld [vmem:[%s1123_s4 + $0xd0] sm:$0xf] }
  0x19   :  { %v728_v25 = vor.u32 %v783_v22, %v725_v23  ;;  %v782_v27 = vld [vmem:[%s1123_s4 + $0xd4] sm:$0xf0]  ;;  %v781_v28 = vld [vmem:[%s1123_s4 + $0xd4] sm:$0xf]  ;;  %v717_v29 = vld [vmem:[%s1123_s4 + $0xd8] sm:$0xf0] }
  0x1a   :  { %101 = vmatpush.bf16.msra.mxu0 %v740_v12  ;;  %295 = vmatpush.bf16.msra.mxu2 %v627_v40  ;;  %v716_v30 = vor.u32 %v782_v27, %v715_v26  ;;  %v720_v31 = vor.u32 %v781_v28, %v717_v29  ;;  %v707_v32 = vld [vmem:[%s1123_s4 + $0xc0] sm:$0xf]  ;;  %v780_v33 = vld [vmem:[%s1123_s4 + $0xc4] sm:$0xf0]  ;;  %v779_v34 = vld [vmem:[%s1123_s4 + $0xc4] sm:$0xf] }
  0x1b   :  { %186 = vmatpush.bf16.msra.mxu1 %v748_v16  ;;  %308 = vmatpush.bf16.msra.mxu3 %v631_v41  ;;  %v785_v16 = vld [vmem:[%s1123_s4 + $0xf4] sm:$0xf]  ;;  %v709_v35 = vld [vmem:[%s1123_s4 + $0xc8] sm:$0xf0]  ;;  %v708_v36 = vor.u32 %v780_v33, %v707_v32  ;;  %v699_v38 = vld [vmem:[%s1123_s4 + $0xb0] sm:$0xf] }
  0x1c   :  { %v736_v21 = vor.u32 %v785_v16, %v733_v18  ;;  %v712_v37 = vor.u32 %v779_v34, %v709_v35  ;;  %v778_v39 = vld [vmem:[%s1123_s4 + $0xb4] sm:$0xf0]  ;;  %v777_v40 = vld [vmem:[%s1123_s4 + $0xb4] sm:$0xf]  ;;  %v701_v41 = vld [vmem:[%s1123_s4 + $0xb8] sm:$0xf0] }
  0x1d   :  { %v700_v42 = vor.u32 %v778_v39, %v699_v38  ;;  %v704_v43 = vor.u32 %v777_v40, %v701_v41  ;;  %v691_v44 = vld [vmem:[%s1123_s4 + $0xa0] sm:$0xf]  ;;  %v776_v45 = vld [vmem:[%s1123_s4 + $0xa4] sm:$0xf0]  ;;  %v685_v61 = vld [vmem:[%s1123_s4 + $0x98] sm:$0xf0] }
  0x1e   :  { %102 = vmatpush.bf16.msra.mxu0 %v739_v13  ;;  %296 = vmatpush.bf16.msra.mxu2 %v619_v46  ;;  %v775_v46 = vld [vmem:[%s1123_s4 + $0xa4] sm:$0xf]  ;;  %v692_v48 = vor.u32 %v776_v45, %v691_v44  ;;  %v772_v0 = vld [vmem:[%s1123_s4 + $0x84] sm:$0xf0]  ;;  %v677_v3 = vld [vmem:[%s1123_s4 + $0x88] sm:$0xf0] }
  0x1f   :  { %187 = vmatpush.bf16.msra.mxu1 %v747_v17  ;;  %309 = vmatpush.bf16.msra.mxu3 %v623_v47  ;;  %v693_v47 = vld [vmem:[%s1123_s4 + $0xa8] sm:$0xf0]  ;;  %v791_v18 = vld [vmem:[%s1124_s5 + $0x1] ss:$0 sm:$0xff] }
  0x20   :  { %v696_v49 = vor.u32 %v775_v46, %v693_v47 }
  0x21   :  { %103 = vmatmul.bf16.vlgmr.msra.gmra.mxu0 %v26_v15  ;;  %v786_v15 = vld [vmem:[%s1123_s4 + $0xf4] sm:$0xf0] }
  0x22   :  { %297 = vmatpush.bf16.msra.mxu2 %v611_v52  ;;  %v732_v17 = vor.u32 %v786_v15, %v731_v14 }
  0x23   :  { %310 = vmatpush.bf16.msra.mxu3 %v615_v53 }
  0x24   :  { %444 = vmatpush.bf16.msrb.mxu1 %v732_v17 }
  0x26   :  { %298 = vmatpush.bf16.msra.mxu2 %v603_v63  ;;  %v675_v63 = vld [vmem:[%s1123_s4 + $0x80] sm:$0xf] }
  0x27   :  { %311 = vmatpush.bf16.msra.mxu3 %v607_v1  ;;  %v771_v1 = vld [vmem:[%s1123_s4 + $0x84] sm:$0xf]  ;;  %v676_v2 = vor.u32 %v772_v0, %v675_v63 }
  0x28   :  { %445 = vmatpush.bf16.msrb.mxu1 %v724_v24  ;;  %v680_v4 = vor.u32 %v771_v1, %v677_v3 }
  0x2a   :  { %299 = vmatpush.bf16.msra.mxu2 %v595_v5  ;;  %v790_v5 = vld [vmem:[%s1124_s5] ss:$0 sm:$0xff] }
  0x2b   :  { %312 = vmatpush.bf16.msra.mxu3 %v599_v7 }
  0x2c   :  { %446 = vmatpush.bf16.msrb.mxu1 %v716_v30 }
  0x2e   :  { %457 = vmatpush.bf16.msrb.mxu2 %v736_v21 }
  0x30   :  { %447 = vmatpush.bf16.msrb.mxu1 %v708_v36 }
  0x32   :  { %458 = vmatpush.bf16.msrb.mxu2 %v728_v25 }
  0x34   :  { %448 = vmatpush.bf16.msrb.mxu1 %v700_v42 }
  0x36   :  { %459 = vmatpush.bf16.msrb.mxu2 %v720_v31 }
  0x38   :  { %449 = vmatpush.bf16.msrb.mxu1 %v692_v48 }
  0x3a   :  { %460 = vmatpush.bf16.msrb.mxu2 %v712_v37 }
  0x3e   :  { %461 = vmatpush.bf16.msrb.mxu2 %v704_v43 }
  0x42   :  { %462 = vmatpush.bf16.msrb.mxu2 %v696_v49 }
  0x9e   :  { %v104_v55 = vpop.f32.mrf.mxu0 }
  0x9f   :  { %v105_v56 = vadd.f32 %v788_v54, %v104_v55  ;;  %v194_v54 = vld [vmem:[%s1120_s1] sm:$0xf] }
  0xa1   :  { %v108_v57 = vmax.f32 %v105_v56, 0.0 }
  0xa3   :  { %v109_v58 = vpack.c.bf16 %v108_v57, %v108_v57  ;;  %v683_v57 = vld [vmem:[%s1123_s4 + $0x90] sm:$0xf] }
  0xa5   :  { %188 = vmatmul.bf16.vlgmr.msra.gmra.mxu1 %v109_v58  ;;  %v774_v58 = vld [vmem:[%s1123_s4 + $0x94] sm:$0xf0] }
  0xa6   :  { %v106_v59 = vpop.f32.mrf.mxu0  ;;  %v684_v60 = vor.u32 %v774_v58, %v683_v57 }
  0xa7   :  { %v773_v59 = vld [vmem:[%s1123_s4 + $0x94] sm:$0xf] }
  0xa8   :  { %v688_v62 = vor.u32 %v773_v59, %v685_v61  ;;  %450 = vmatpush.bf16.msrb.mxu1 %v684_v60 }
  0xaa   :  { %463 = vmatpush.bf16.msrb.mxu2 %v688_v62 }
  0xac   :  { %451 = vmatpush.bf16.msrb.mxu1 %v676_v2 }
  0xae   :  { %464 = vmatpush.bf16.msrb.mxu2 %v680_v4 }
 0x122   :  { %v189_v9 = vpop.f32.mrf.mxu1 }
 0x123   :  { %v190_v10 = vadd.f32 %v789_v8, %v189_v9 }
 0x125   :  { %v193_v11 = vmax.f32 %v190_v10, 0.0 }
 0x127   :  { %v195_v12 = vpack.c.bf16 %v193_v11, %v193_v11 }
 0x129   :  { %300 = vmatmul.bf16.vlgmr.msra.gmra.mxu2 %v195_v12  ;;  %313 = vmatmul.bf16.vlgmr.msra.gmra.mxu3 %v195_v12 }
 0x12a   :  { %v191_v13 = vpop.f32.mrf.mxu1 }
 0x1ac   :  { %v301_v50 = vpop.f32.mrf.mxu2  ;;  %v314_v51 = vpop.f32.mrf.mxu3 }
 0x1ad   :  { %v318_v52 = vpack.c.bf16 %v301_v50, %v301_v50 }
 0x1af   :  { %v325_v53 = vsel %vm323_vm0, %v318_v52, 0 }
 0x1b0   :  { %334 = vmatpush.bf16.msrb.mxu0 %v325_v53 }
 0x1b3   :  { %656 = vmatmul.msk.bf16.vlgmr.msrb.gmra.mxu0 %vm319_vm1, %v194_v54 }
 0x1b4   :  { %v303_v55 = vpop.f32.mrf.mxu2  ;;  %v316_v56 = vpop.f32.mrf.mxu3 }
 0x230   :  { %v336_v6 = vpop.f32.mrf.mxu0 }
 0x231   :  { %v337_v7 = vadd.f32 %v336_v6, %v314_v51 }
 0x233   :  { %v344_v8 = vadd.f32 %v790_v5, %v337_v7 }
 0x235   :  { %v345_v9 = vmax.f32 %v344_v8, 0.0 }
 0x237   :  { %v346_v10 = vpack.c.bf16 %v345_v9, %v345_v9 }
 0x238   :  { %v338_v11 = vpop.f32.mrf.mxu0 }
 0x239   :  { %452 = vmatmul.bf16.vlgmr.msrb.gmra.mxu1 %v346_v10  ;;  %465 = vmatmul.bf16.vlgmr.msrb.gmra.mxu2 %v346_v10 }
 0x2b6   :  { %v453_v12 = vpop.f32.mrf.mxu1 }
 0x2b7   :  { %v470_v13 = vpack.c.bf16 %v453_v12, %v453_v12 }
 0x2b9   :  { %v472_v14 = vsel %vm323_vm0, %v470_v13, 0 }
 0x2ba   :  { %481 = vmatpush.bf16.msrb.mxu3 %v472_v14 }
 0x2bc   :  { %v466_v15 = vpop.f32.mrf.mxu2 }
 0x2bd   :  { %737 = vmatmul.msk.bf16.vlgmr.msrb.gmra.mxu3 %vm319_vm1, %v194_v54 }
 0x2be   :  { %v455_v16 = vpop.f32.mrf.mxu1 }
 0x2c4   :  { %v468_v17 = vpop.f32.mrf.mxu2 }
 0x340   :  { %v483_v19 = vpop.f32.mrf.mxu3 }
 0x341   :  { %v484_v20 = vadd.f32 %v483_v19, %v466_v15 }
 0x343   :  { %v492_v21 = vadd.f32 %v791_v18, %v484_v20 }
 0x345   :  { %v493_v22 = vmax.f32 %v492_v21, 0.0 }
 0x347   :  { %494 = vst [vmem:[#allocation2] sm:$0xff] %v493_v22 }
 0x348   :  { %v485_v23 = vpop.f32.mrf.mxu3  ;;  %505 = dma.vmem_to_hbm [thread:$0]  %s501_s0, 128, %s503_s13, [#allocation3]  }
 0x349   :  { %816 = dma.done.wait [#allocation3], 128  }
 0x34a   :  { %817 = vsyncadd [#allocation3], 4294967168 }
 0x34b   :  { %510 = vsyncpa [#allocation3], 1 }

</bundles_post_ra>
